<compile_context>
chip_gen: v6e
topology: v6e:2x2x1
jax: 0.10.0
libtpu: 0.0.40
codegen_flags: <defaults>
</compile_context>

<pallas_src>
import jax
import jax.numpy as jnp
from jax import lax
from jax.experimental import pallas as pl
from jax.experimental.pallas import tpu as pltpu


_LANE = 128                       # lane width: embedding dim padded to this
_LABEL_ALIGN = 256                # label dim padded to full v6e/v7x MXU width
_NEG_BIG = -1e30                  # padded-label bias; exp underflows to exactly 0.0
_NBUF = 4                         # token double... quad-buffer depth for the HBM path
_RESIDENT_TABLE_BYTES = 16 * 1024 * 1024   # table <= this -> VMEM-resident fast path


def _round_up(x, m):
    return ((x + m - 1) // m) * m


def _finalize(acc, w_ref, b_ref, out_ref):
    """logits = sum(token_reps) @ (W^T / L) + b, then stable log_softmax."""
    logits = (
        jnp.dot(acc[...], w_ref[...], preferred_element_type=jnp.float32)
        + b_ref[...]
    )                                                    # (TB, C_pad)
    m = jnp.max(logits, axis=-1, keepdims=True)
    shifted = logits - m
    lse = jnp.log(jnp.sum(jnp.exp(shifted), axis=-1, keepdims=True))
    out_ref[...] = (shifted - lse).astype(out_ref.dtype)


# ----------------------------------------------------------------------------
# Fast path: embedding table resident in VMEM, gather = dynamic row slices.
# ----------------------------------------------------------------------------
def _fasttext_resident_kernel(ids_ref, embed_ref, w_ref, b_ref, out_ref, acc):
    """ids_ref: (TB, L) SMEM int32; embed_ref: (V_pad, D_pad) VMEM;
    w_ref: (D_pad, C_pad); b_ref: (1, C_pad); acc: (TB, D_pad) f32 scratch."""
    TB, L = ids_ref.shape
    D_pad = acc.shape[1]
    zero_row = jnp.zeros((1, D_pad), jnp.float32)        # hoisted out of the loops

    def gather_row(b):
        r = zero_row
        if L <= 64:                                      # static unroll over tokens
            for l in range(L):
                row = ids_ref[b, l]
                r = r + embed_ref[pl.ds(row, 1), :].astype(jnp.float32)
        else:
            def body_l(l, r):
                row = ids_ref[b, l]
                return r + embed_ref[pl.ds(row, 1), :].astype(jnp.float32)
            r = lax.fori_loop(0, L, body_l, r)
        return r

    def body_b(b, carry):
        acc[pl.ds(b, 1), :] = gather_row(b)
        return carry

    lax.fori_loop(0, TB, body_b, 0)
    _finalize(acc, w_ref, b_ref, out_ref)


# ----------------------------------------------------------------------------
# Fallback path: table stays in HBM, manual per-row DMA gather, 4 slots deep.
# ----------------------------------------------------------------------------
def _fasttext_hbm_kernel(ids_ref, embed_hbm, w_ref, b_ref, out_ref, buf, sems, acc):
    """ids_ref: (TB, L) SMEM; embed_hbm: (V_pad, D_pad) in HBM (pl.ANY);
    buf: (_NBUF, TB, D_pad) VMEM; sems: (_NBUF, TB) DMA sems; acc: (TB, D_pad) f32."""
    TB, D_pad = acc.shape
    L = ids_ref.shape[1]

    def issue(l, slot):
        # Hoist all scalar id reads before any DMA start (and before any .wait()).
        rows = [ids_ref[b, l] for b in range(TB)]
        for b in range(TB):
            pltpu.make_async_copy(
                embed_hbm.at[pl.ds(rows[b], 1), :],
                buf.at[slot, pl.ds(b, 1), :],
                sems.at[slot, b],
            ).start()

    def wait(slot):
        for b in range(TB):
            # Shape-only source descriptor; it must match the started (1, D_pad)
            # copy -- the semaphore does the actual synchronization.
            pltpu.make_async_copy(
                embed_hbm.at[pl.ds(0, 1), :],
                buf.at[slot, pl.ds(b, 1), :],
                sems.at[slot, b],
            ).wait()

    # Prime the pipeline with up to _NBUF-1 tokens of gathers in flight.
    for t in range(min(_NBUF - 1, L)):
        issue(t, t % _NBUF)
    acc[...] = jnp.zeros_like(acc)

    @pl.loop(0, L)
    def _(l):
        slot = l & (_NBUF - 1)
        nxt = l + (_NBUF - 1)

        @pl.when(nxt < L)                 # keep 3 tokens ahead; issued before the wait
        def _():
            issue(nxt, nxt & (_NBUF - 1))

        wait(slot)
        acc[...] += buf[slot].astype(jnp.float32)

    _finalize(acc, w_ref, b_ref, out_ref)


# ----------------------------------------------------------------------------
# Wrapper
# ----------------------------------------------------------------------------
def fasttext_pallas(input_ids, embed, w_t, bias, *, tile_b=128, force_hbm=False):
    """input_ids: (B, L) int; embed: (V, D); w_t: (D, C); bias: (C,) -> (B, C) log-probs."""
    B, L = input_ids.shape
    V, D_emb = embed.shape
    Dw, C = w_t.shape

    D_pad = _round_up(D_emb, _LANE)
    V_pad = _round_up(V, 8)
    C_pad = _round_up(C, _LABEL_ALIGN)

    TB = min(tile_b, B)
    # Keep >=2 batch tiles when the batch is large enough to split (v7x has 2 TCs).
    if B >= 16 and (B + TB - 1) // TB < 2:
        TB = _round_up((B + 1) // 2, 8)
    B_pad = _round_up(B, TB)

    ids = input_ids.astype(jnp.int32)
    if B_pad != B:
        ids = jnp.pad(ids, ((0, B_pad - B), (0, 0)))     # pad rows gather row 0; sliced off

    # Lane-pad the table (init_params pre-pads, so this is a no-op there; external
    # unpadded tables pay a one-off pad per call).
    if (V, D_emb) != (V_pad, D_pad):
        embed = jnp.pad(embed, ((0, V_pad - V), (0, D_pad - D_emb)))

    # Fold the sequence-mean 1/L into the weight; zero-pad D rows, pad label lanes.
    w_pad = jnp.zeros((D_pad, C_pad), jnp.float32).at[:Dw, :C].set(
        w_t.astype(jnp.float32) * (1.0 / L))
    b_pad = jnp.full((1, C_pad), _NEG_BIG, jnp.float32).at[0, :C].set(
        bias.astype(jnp.float32))

    table_bytes = V_pad * D_pad * embed.dtype.itemsize
    resident = (not force_hbm) and (table_bytes <= _RESIDENT_TABLE_BYTES)

    ids_spec = pl.BlockSpec((TB, L), lambda i: (i, 0),
                            memory_space=pltpu.MemorySpace.SMEM)
    w_spec = pl.BlockSpec((D_pad, C_pad), lambda i: (0, 0))
    b_spec = pl.BlockSpec((1, C_pad), lambda i: (0, 0))
    out_spec = pl.BlockSpec((TB, C_pad), lambda i: (i, 0))

    if resident:
        kernel = _fasttext_resident_kernel
        embed_spec = pl.BlockSpec((V_pad, D_pad), lambda i: (0, 0))  # whole table in VMEM
        scratch = [pltpu.VMEM((TB, D_pad), jnp.float32)]
        # Table is double-buffered by the pipeline even though its block never
        # changes; budget 2x table + headroom, capped v7x-safe (64 MiB physical).
        vmem_limit = min(2 * table_bytes + (16 << 20), 56 << 20)
    else:
        kernel = _fasttext_hbm_kernel
        embed_spec = pl.BlockSpec(memory_space=pl.ANY)               # table stays in HBM
        scratch = [
            pltpu.VMEM((_NBUF, TB, D_pad), embed.dtype),             # gathered-row buffers
            pltpu.SemaphoreType.DMA((_NBUF, TB)),
            pltpu.VMEM((TB, D_pad), jnp.float32),                    # sequence-sum accumulator
        ]
        vmem_limit = 32 << 20

    cost = pl.CostEstimate(
        flops=2 * B_pad * D_pad * C_pad + B_pad * L * D_pad,
        transcendentals=B_pad * C_pad + B_pad,
        bytes_accessed=(B_pad * L * D_pad * embed.dtype.itemsize   # gathered rows
                        + table_bytes                              # table itself
                        + B_pad * L * 4                            # ids
                        + D_pad * C_pad * 4                        # weight
                        + B_pad * C_pad * 4),                      # output
    )

    out = pl.pallas_call(
        kernel,
        out_shape=jax.ShapeDtypeStruct((B_pad, C_pad), jnp.float32),
        grid_spec=pltpu.PrefetchScalarGridSpec(
            num_scalar_prefetch=0,
            grid=(B_pad // TB,),
            in_specs=[ids_spec, embed_spec, w_spec, b_spec],
            out_specs=out_spec,
            scratch_shapes=scratch,
        ),
        compiler_params=pltpu.CompilerParams(
            dimension_semantics=("parallel",),
            vmem_limit_bytes=vmem_limit,
        ),
        cost_estimate=cost,
    )(ids, embed, w_pad, b_pad)

    return out[:B, :C]


def init_params(key, vocab_size, embed_dim, num_labels, pad_idx,
                embed_dtype=jnp.float32):
    k_emb, k_w, k_b = jax.random.split(key, 3)
    # nn.Embedding: normal(0, 1) init, padding_idx row zeroed.
    embed = jax.random.normal(k_emb, (vocab_size, embed_dim), jnp.float32)
    embed = embed.at[pad_idx].set(0.0)
    # Pre-pad once at init (row dim to 8, lane dim to 128) so the forward pass
    # never pays a per-call whole-table pad; padded rows/lanes are zero.
    v_pad = _round_up(vocab_size, 8)
    d_pad = _round_up(embed_dim, _LANE)
    embed = jnp.pad(embed, ((0, v_pad - vocab_size), (0, d_pad - embed_dim)))
    embed = embed.astype(embed_dtype)   # bf16 halves gather bytes (useful on v5e)
    # nn.Linear(embed_dim, num_labels): weight (C, D), bias (C,), uniform(-k, k).
    bound = 1.0 / (embed_dim ** 0.5)
    w = jax.random.uniform(k_w, (num_labels, embed_dim), jnp.float32, -bound, bound)
    b = jax.random.uniform(k_b, (num_labels,), jnp.float32, -bound, bound)
    # fc1 weight stored pre-transposed (D, C): hoists the transpose out of the fwd path.
    return {"embed": embed, "w_t": w.T, "b": b}


@jax.jit
def fasttext_forward(params, input_ids, seq_len=None, label_ids=None):
    # seq_len is accepted but unused, exactly like the PyTorch module (the mean
    # divides by L and includes padding positions).
    del seq_len
    probs = fasttext_pallas(input_ids, params["embed"], params["w_t"], params["b"])
    if label_ids is None:
        return None, probs
    # CrossEntropyLoss(logits, labels) == NLL of log_softmax(logits); probs are log-probs.
    nll = -jnp.take_along_axis(probs, label_ids[:, None], axis=-1)[:, 0]
    return jnp.mean(nll), probs


if __name__ == "__main__":
    VOCAB, EMBED_DIM, NUM_LABELS, PAD_IDX = 100, 32, 8, 0
    B, L = 2, 8

    key = jax.random.PRNGKey(0)
    k_params, k_ids, k_lbl = jax.random.split(key, 3)
    params = init_params(k_params, VOCAB, EMBED_DIM, NUM_LABELS, PAD_IDX)

    input_ids = jax.random.randint(k_ids, (B, L), 0, VOCAB, dtype=jnp.int32)
    seq_len = jnp.full((B,), L, dtype=jnp.int32)
    label_ids = jax.random.randint(k_lbl, (B,), 0, NUM_LABELS, dtype=jnp.int32)

    # Default path (small table -> VMEM-resident gather).
    loss, probs = fasttext_forward(params, input_ids, seq_len, label_ids)
    probs = jax.block_until_ready(probs)

    # Also exercise the HBM-DMA fallback path (used for tables that don't fit VMEM).
    probs_hbm = jax.block_until_ready(
        jax.jit(lambda i, e, w, b: fasttext_pallas(i, e, w, b, force_hbm=True))(
            input_ids, params["embed"], params["w_t"], params["b"]))

    # Pure-JAX reference on the unpadded parameter views.
    emb = params["embed"][:VOCAB, :EMBED_DIM].astype(jnp.float32)
    tok = jnp.take(emb, input_ids, axis=0)
    logits_ref = tok.mean(1) @ params["w_t"] + params["b"]
    probs_ref = jax.nn.log_softmax(logits_ref, axis=-1)

    assert probs.shape == (B, NUM_LABELS)
    assert jnp.allclose(probs, probs_ref, atol=1e-4, rtol=1e-4)
    assert jnp.allclose(probs_hbm, probs_ref, atol=1e-4, rtol=1e-4)
    assert jnp.allclose(jnp.sum(jnp.exp(probs), axis=-1), 1.0, atol=1e-4)
    assert bool(jnp.isfinite(loss))

    print("KERNEL_OK")
</pallas_src>

<mosaic_0001>
module attributes {stable_mosaic.version = 11 : i64} {
  func.func @_fasttext_resident_kernel(%arg0: i32, %arg1: memref<2x8xi32, #tpu.memory_space<smem>>, %arg2: memref<104x128xf32, #tpu.memory_space<vmem>>, %arg3: memref<128x256xf32, #tpu.memory_space<vmem>>, %arg4: memref<1x256xf32, #tpu.memory_space<vmem>>, %arg5: memref<2x256xf32, #tpu.memory_space<vmem>>, %arg6: memref<2x128xf32, #tpu.memory_space<vmem>>) attributes {dimension_semantics = [#tpu.dimension_semantics<parallel>], iteration_bounds = array<i64: 1>, scalar_prefetch = 0 : i64, scratch_operands = 1 : i64, tpu.core_type = #tpu.core_type<tc>, window_params = [{transform_indices = @transform_0, window_bounds = array<i64: 2, 8>}, {pipeline_mode = #tpu.pipeline_mode<synchronous>, transform_indices = @transform_1, window_bounds = array<i64: 104, 128>}, {pipeline_mode = #tpu.pipeline_mode<synchronous>, transform_indices = @transform_2, window_bounds = array<i64: 128, 256>}, {pipeline_mode = #tpu.pipeline_mode<synchronous>, transform_indices = @transform_3, window_bounds = array<i64: 1, 256>}, {transform_indices = @transform_4, window_bounds = array<i64: 2, 256>}]} {
    %cst = arith.constant 0.000000e+00 : f32
    %0 = vector.broadcast %cst : f32 to vector<1x128xf32>
    %c0_i32 = arith.constant 0 : i32
    %c2_i32 = arith.constant 2 : i32
    %1 = arith.addi %c0_i32, %c2_i32 : i32
    %c1_i32 = arith.constant 1 : i32
    scf.for %arg7 = %c0_i32 to %1 step %c1_i32  : i32 {
      %19 = arith.index_cast %arg7 : i32 to index
      %c0_11 = arith.constant 0 : index
      %20 = memref.load %arg1[%19, %c0_11] : memref<2x8xi32, #tpu.memory_space<smem>>
      %21 = arith.index_cast %20 : i32 to index
      %c0_12 = arith.constant 0 : index
      %22 = vector.load %arg2[%21, %c0_12] : memref<104x128xf32, #tpu.memory_space<vmem>>, vector<1x128xf32>
      %23 = arith.addf %0, %22 : vector<1x128xf32>
      %24 = arith.index_cast %arg7 : i32 to index
      %c1 = arith.constant 1 : index
      %25 = memref.load %arg1[%24, %c1] : memref<2x8xi32, #tpu.memory_space<smem>>
      %26 = arith.index_cast %25 : i32 to index
      %c0_13 = arith.constant 0 : index
      %27 = vector.load %arg2[%26, %c0_13] : memref<104x128xf32, #tpu.memory_space<vmem>>, vector<1x128xf32>
      %28 = arith.addf %23, %27 : vector<1x128xf32>
      %29 = arith.index_cast %arg7 : i32 to index
      %c2 = arith.constant 2 : index
      %30 = memref.load %arg1[%29, %c2] : memref<2x8xi32, #tpu.memory_space<smem>>
      %31 = arith.index_cast %30 : i32 to index
      %c0_14 = arith.constant 0 : index
      %32 = vector.load %arg2[%31, %c0_14] : memref<104x128xf32, #tpu.memory_space<vmem>>, vector<1x128xf32>
      %33 = arith.addf %28, %32 : vector<1x128xf32>
      %34 = arith.index_cast %arg7 : i32 to index
      %c3 = arith.constant 3 : index
      %35 = memref.load %arg1[%34, %c3] : memref<2x8xi32, #tpu.memory_space<smem>>
      %36 = arith.index_cast %35 : i32 to index
      %c0_15 = arith.constant 0 : index
      %37 = vector.load %arg2[%36, %c0_15] : memref<104x128xf32, #tpu.memory_space<vmem>>, vector<1x128xf32>
      %38 = arith.addf %33, %37 : vector<1x128xf32>
      %39 = arith.index_cast %arg7 : i32 to index
      %c4 = arith.constant 4 : index
      %40 = memref.load %arg1[%39, %c4] : memref<2x8xi32, #tpu.memory_space<smem>>
      %41 = arith.index_cast %40 : i32 to index
      %c0_16 = arith.constant 0 : index
      %42 = vector.load %arg2[%41, %c0_16] : memref<104x128xf32, #tpu.memory_space<vmem>>, vector<1x128xf32>
      %43 = arith.addf %38, %42 : vector<1x128xf32>
      %44 = arith.index_cast %arg7 : i32 to index
      %c5 = arith.constant 5 : index
      %45 = memref.load %arg1[%44, %c5] : memref<2x8xi32, #tpu.memory_space<smem>>
      %46 = arith.index_cast %45 : i32 to index
      %c0_17 = arith.constant 0 : index
      %47 = vector.load %arg2[%46, %c0_17] : memref<104x128xf32, #tpu.memory_space<vmem>>, vector<1x128xf32>
      %48 = arith.addf %43, %47 : vector<1x128xf32>
      %49 = arith.index_cast %arg7 : i32 to index
      %c6 = arith.constant 6 : index
      %50 = memref.load %arg1[%49, %c6] : memref<2x8xi32, #tpu.memory_space<smem>>
      %51 = arith.index_cast %50 : i32 to index
      %c0_18 = arith.constant 0 : index
      %52 = vector.load %arg2[%51, %c0_18] : memref<104x128xf32, #tpu.memory_space<vmem>>, vector<1x128xf32>
      %53 = arith.addf %48, %52 : vector<1x128xf32>
      %54 = arith.index_cast %arg7 : i32 to index
      %c7 = arith.constant 7 : index
      %55 = memref.load %arg1[%54, %c7] : memref<2x8xi32, #tpu.memory_space<smem>>
      %56 = arith.index_cast %55 : i32 to index
      %c0_19 = arith.constant 0 : index
      %57 = vector.load %arg2[%56, %c0_19] : memref<104x128xf32, #tpu.memory_space<vmem>>, vector<1x128xf32>
      %58 = arith.addf %53, %57 : vector<1x128xf32>
      %59 = arith.index_cast %arg7 : i32 to index
      %c0_20 = arith.constant 0 : index
      %60 = vector.load %arg6[%59, %c0_20] : memref<2x128xf32, #tpu.memory_space<vmem>>, vector<1x128xf32>
      tpu.vector_store %arg6[%59, %c0_20], %58 {strides = array<i32>} : memref<2x128xf32, #tpu.memory_space<vmem>>, vector<1x128xf32>,
    }
    %c2_i32_0 = arith.constant 2 : i32
    %c0 = arith.constant 0 : index
    %c0_1 = arith.constant 0 : index
    %2 = vector.load %arg6[%c0, %c0_1] : memref<2x128xf32, #tpu.memory_space<vmem>>, vector<2x128xf32>
    %c0_2 = arith.constant 0 : index
    %c0_3 = arith.constant 0 : index
    %3 = vector.load %arg3[%c0_2, %c0_3] : memref<128x256xf32, #tpu.memory_space<vmem>>, vector<128x256xf32>
    %cst_4 = arith.constant dense<0.000000e+00> : vector<2x256xf32>
    %4 = tpu.matmul %2, %3, %cst_4 {dimension_numbers = #tpu.dot_dimension_numbers<[1], [0], [0], [1], [0, 0, 1, 1], [], []>} : vector<2x128xf32>, vector<128x256xf32>, vector<2x256xf32> -> vector<2x256xf32>
    %c0_5 = arith.constant 0 : index
    %c0_6 = arith.constant 0 : index
    %5 = vector.load %arg4[%c0_5, %c0_6] : memref<1x256xf32, #tpu.memory_space<vmem>>, vector<1x256xf32>
    %6 = vector.broadcast %5 : vector<1x256xf32> to vector<2x256xf32>
    %7 = arith.addf %4, %6 : vector<2x256xf32>
    %cst_7 = arith.constant dense<0xFF800000> : vector<2xf32>
    %8 = vector.multi_reduction <maximumf>, %7, %cst_7 [1] : vector<2x256xf32> to vector<2xf32>
    %9 = vector.shape_cast %8 : vector<2xf32> to vector<2x1xf32>
    %10 = vector.broadcast %9 : vector<2x1xf32> to vector<2x256xf32>
    %11 = arith.subf %7, %10 : vector<2x256xf32>
    %12 = math.exp %11 : vector<2x256xf32>
    %cst_8 = arith.constant dense<0.000000e+00> : vector<2xf32>
    %13 = vector.multi_reduction <add>, %12, %cst_8 [1] : vector<2x256xf32> to vector<2xf32>
    %14 = vector.shape_cast %13 : vector<2xf32> to vector<2x1xf32>
    %15 = math.log %14 : vector<2x1xf32>
    %16 = vector.broadcast %15 : vector<2x1xf32> to vector<2x256xf32>
    %17 = arith.subf %11, %16 : vector<2x256xf32>
    %c0_9 = arith.constant 0 : index
    %c0_10 = arith.constant 0 : index
    %18 = vector.load %arg5[%c0_9, %c0_10] : memref<2x256xf32, #tpu.memory_space<vmem>>, vector<2x256xf32>
    tpu.vector_store %arg5[%c0_9, %c0_10], %17 {strides = array<i32>} : memref<2x256xf32, #tpu.memory_space<vmem>>, vector<2x256xf32>,
    return
  }
  func.func @transform_0(%arg0: i32) -> (i32, i32) {
    %c0_i32 = arith.constant 0 : i32
    %c0_i32_0 = arith.constant 0 : i32
    return %arg0, %c0_i32 : i32, i32
  }
  func.func @transform_1(%arg0: i32) -> (i32, i32) {
    %c0_i32 = arith.constant 0 : i32
    %c0_i32_0 = arith.constant 0 : i32
    %c0_i32_1 = arith.constant 0 : i32
    return %c0_i32, %c0_i32_0 : i32, i32
  }
  func.func @transform_2(%arg0: i32) -> (i32, i32) {
    %c0_i32 = arith.constant 0 : i32
    %c0_i32_0 = arith.constant 0 : i32
    %c0_i32_1 = arith.constant 0 : i32
    return %c0_i32, %c0_i32_0 : i32, i32
  }
  func.func @transform_3(%arg0: i32) -> (i32, i32) {
    %c0_i32 = arith.constant 0 : i32
    %c0_i32_0 = arith.constant 0 : i32
    %c0_i32_1 = arith.constant 0 : i32
    return %c0_i32, %c0_i32_0 : i32, i32
  }
  func.func @transform_4(%arg0: i32) -> (i32, i32) {
    %c0_i32 = arith.constant 0 : i32
    %c0_i32_0 = arith.constant 0 : i32
    return %arg0, %c0_i32 : i32, i32
  }
}

</mosaic_0001>

<bundles_post_ra>
// kernel: fasttext_forward.1
= control target key start
LH: loop header
LB: loop body
LE: loop exit
PB: predicated region body
PF: predicated region fallthrough
CT: control target
= control target key end

     0   :  { %9 = vsyncpa [#allocation4], 0  ;;  %s456_s0 = inlined_call_operand.vmem [shape: s32[2,8], index: 0, kind: input, shape index: {}]   ;;  %s457_s1 = inlined_call_operand.vmem [shape: f32[104,128], index: 1, kind: input, shape index: {}]   ;;  %s458_s2 = inlined_call_operand.vmem [shape: f32[128,256], index: 2, kind: input, shape index: {}]   ;;  %s459_s3 = inlined_call_operand.vmem [shape: f32[1,256], index: 3, kind: input, shape index: {}]   ;;  %s460_s4 = inlined_call_operand.vmem [shape: f32[2,256], index: 4, kind: output, shape index: {}]  }
   0x1   :  { %s16_s17 = sshll.u32 %s456_s0, 4  ;;  %s17_s17 = int_to_ptr.vmem [resolvable:$true] %s16_s17 }
   0x2   :  { %s264_s18 = scalar_lea.vmem %s17_s17, 32  ;;  %p269_p1 = scmp.lt.s32.totalorder %s17_s17, %s17_s17 }
   0x3   :  { %p265_p0 = scmp.ne.s32.totalorder %s17_s17, %s264_s18  ;;  %p270_p2 = scmp.lt.s32.totalorder %s264_s18, %s264_s18 }
   0x5   :  { %p271_p3 = por %p270_p2, %p269_p1 }
   0x7   :  { %p272_p4 = pnand %p271_p3, %p265_p0 }
   0x9   :  { %275 = shalt.err (!%p272_p4)
}
   0xa   :  { %s286_s19 = smov [#allocation3]  }
   0xb   :  { %19 = dma.vmem_to_smem %s17_s17, 32, %s286_s19, [#allocation4]  }
   0xc   :  { %280 = dma.done.wait [#allocation4], 32  }
   0xd   :  { %281 = vsyncadd [#allocation4], 4294967264 }
   0xe   :  { %29 = sfence }
   0xf   :  { %s316_s20 = smov 0  }
  0x10 LB: > { %s246_s0 = sshll.u32 %s284_s20, 7  ;;  %s284_s20 = sphi %s316_s20, %s35_s20  }
  0x11   : > { %s37_s21 = sld [smem:[#allocation3 + %s246_s0]]  ;;  %s41_s22 = sadd.s32 1, %s246_s0 }
  0x12   : > { %s42_s23 = sld [smem:[#allocation3 + %s41_s22]]  ;;  %s46_s24 = sadd.s32 2, %s246_s0 }
  0x13   : > { %s47_s25 = sld [smem:[#allocation3 + %s46_s24]]  ;;  %s51_s26 = sadd.s32 3, %s246_s0 }
  0x14   : > { %s52_s27 = sld [smem:[#allocation3 + %s51_s26]]  ;;  %s56_s28 = sadd.s32 4, %s246_s0 }
  0x15   : > { %s57_s29 = sld [smem:[#allocation3 + %s56_s28]]  ;;  %s61_s30 = sadd.s32 5, %s246_s0 }
  0x16   : > { %s62_s5 = sld [smem:[#allocation3 + %s61_s30]]  ;;  %s66_s6 = sadd.s32 6, %s246_s0 }
  0x17   : > { %s38_s9 = scalar_lea.vmem %s457_s1, %s37_s21  ;;  %s67_s10 = sld [smem:[#allocation3 + %s66_s6]] }
  0x18   : > { %v39_v0 = vld [vmem:[%s38_s9] sm:$0x1]  ;;  %s43_s13 = scalar_lea.vmem %s457_s1, %s42_s23  ;;  %s71_s14 = sadd.s32 7, %s246_s0 }
  0x19   : > { %v44_v1 = vld [vmem:[%s43_s13] sm:$0x1]  ;;  %s48_s17 = scalar_lea.vmem %s457_s1, %s47_s25  ;;  %s72_s18 = sld [smem:[#allocation3 + %s71_s14]] }
  0x1a   : > { %v45_v2 = vadd.f32 %v44_v1, %v39_v0  ;;  %v49_v3 = vld [vmem:[%s48_s17] sm:$0x1]  ;;  %s53_s24 = scalar_lea.vmem %s457_s1, %s52_s27 }
  0x1b   : > { %v54_v4 = vld [vmem:[%s53_s24] sm:$0x1]  ;;  %s58_s28 = scalar_lea.vmem %s457_s1, %s57_s29  ;;  %s76_s29 = scalar_lea.vmem [#allocation2], %s284_s20 }
  0x1c   : > { %v50_v5 = vadd.f32 %v49_v3, %v45_v2  ;;  %s63_s30 = scalar_lea.vmem %s457_s1, %s62_s5  ;;  %v59_v6 = vld [vmem:[%s58_s28] sm:$0x1]  ;;  %s35_s20 = sadd.s32 1, %s284_s20  }
  0x1d   : > { %s68_s7 = scalar_lea.vmem %s457_s1, %s67_s10  ;;  %v64_v8 = vld [vmem:[%s63_s30] sm:$0x1]  ;;  %p32_p5 = scmp.ge.s32.totalorder %s35_s20, 2  }
  0x1e   : > { %v55_v7 = vadd.f32 %v54_v4, %v50_v5  ;;  %v69_v10 = vld [vmem:[%s68_s7] sm:$0x1]  ;;  %v110_v15 = vld [vmem:[%s458_s2 + $0xf8] sm:$0xff] (%p32_p5)  ;;  %v109_v16 = vld [vmem:[%s458_s2 + $0xf0] sm:$0xff] (%p32_p5)  ;;  %v287_v19 = vmov (%p32_p5), 0.0   ;;  %v113_v49 = vlaneseq (%p32_p5)  ;;  %vm194_vm0 = vcmask (%p32_p5), 1041408  }
  0x1f   : > { %s73_s9 = scalar_lea.vmem %s457_s1, %s72_s18  ;;  %v108_v17 = vld [vmem:[%s458_s2 + $0xe8] sm:$0xff] (%p32_p5)  ;;  %123 = vmatprep.subr.mxu0 (%p32_p5), %v110_v15  ;;  %v107_v18 = vld [vmem:[%s458_s2 + $0xe0] sm:$0xff] (%p32_p5)  ;;  %187 = vmatprep.mubr.f32.mxu0 (%p32_p5), %v287_v19  ;;  %v106_v20 = vld [vmem:[%s458_s2 + $0xd8] sm:$0xff] (%p32_p5) }
  0x20   : > { %v60_v9 = vadd.f32 %v59_v6, %v55_v7  ;;  %v74_v12 = vld [vmem:[%s73_s9] sm:$0x1]  ;;  %124 = vmatpush1.msra.mxu0 (%p32_p5), %v109_v16  ;;  %v105_v21 = vld [vmem:[%s458_s2 + $0xd0] sm:$0xff] (%p32_p5)  ;;  %v104_v22 = vld [vmem:[%s458_s2 + $0xc8] sm:$0xff] (%p32_p5)  ;;  %v114_v50 = vshrl.u32 (%p32_p5), %v113_v49, 7 }
  0x21   :  { %125 = vmatprep.subr.mxu0 (%p32_p5), %v108_v17  ;;  %v103_v23 = vld [vmem:[%s458_s2 + $0xc0] sm:$0xff] (%p32_p5)  ;;  %v102_v24 = vld [vmem:[%s458_s2 + $0xb8] sm:$0xff] (%p32_p5)  ;;  %v101_v25 = vld [vmem:[%s458_s2 + $0xb0] sm:$0xff] (%p32_p5) }
  0x22   : > { %v65_v11 = vadd.f32 %v64_v8, %v60_v9  ;;  %126 = vmatpush1.msra.mxu0 (%p32_p5), %v107_v18  ;;  %v100_v26 = vld [vmem:[%s458_s2 + $0xa8] sm:$0xff] (%p32_p5)  ;;  %v99_v27 = vld [vmem:[%s458_s2 + $0xa0] sm:$0xff] (%p32_p5)  ;;  %v98_v28 = vld [vmem:[%s458_s2 + $0x98] sm:$0xff] (%p32_p5)  ;;  %v115_v51 = vsub.s32 (%p32_p5), 0, %v114_v50  ;;  %v119_v53 = vsub.s32 (%p32_p5), 1, %v114_v50 }
  0x23   :  { %127 = vmatprep.subr.mxu0 (%p32_p5), %v106_v20  ;;  %v97_v29 = vld [vmem:[%s458_s2 + $0x90] sm:$0xff] (%p32_p5)  ;;  %v96_v30 = vld [vmem:[%s458_s2 + $0x88] sm:$0xff] (%p32_p5)  ;;  %v95_v31 = vld [vmem:[%s458_s2 + $0x80] sm:$0xff] (%p32_p5) }
  0x24   : > { %v70_v13 = vadd.f32 %v69_v10, %v65_v11  ;;  %34 = sbr.rel (!%p32_p5) target bundleno = 16 (0x10), region = 56  ;;  %128 = vmatpush1.msra.mxu0 (%p32_p5), %v105_v21  ;;  %v94_v32 = vld [vmem:[%s458_s2 + $0x78] sm:$0xff] (%p32_p5)  ;;  %v93_v33 = vld [vmem:[%s458_s2 + $0x70] sm:$0xff] (%p32_p5)  ;;  %v92_v34 = vld [vmem:[%s458_s2 + $0x68] sm:$0xff] (%p32_p5) }
  0x25   :  { %129 = vmatprep.subr.mxu0 (%p32_p5), %v104_v22  ;;  %v91_v35 = vld [vmem:[%s458_s2 + $0x60] sm:$0xff] (%p32_p5)  ;;  %v90_v36 = vld [vmem:[%s458_s2 + $0x58] sm:$0xff] (%p32_p5)  ;;  %v89_v37 = vld [vmem:[%s458_s2 + $0x50] sm:$0xff] (%p32_p5) }
  0x26   : > { %v75_v14 = vadd.f32 %v74_v12, %v70_v13  ;;  %130 = vmatpush1.msra.mxu0 (%p32_p5), %v103_v23  ;;  %v88_v38 = vld [vmem:[%s458_s2 + $0x48] sm:$0xff] (%p32_p5)  ;;  %v87_v39 = vld [vmem:[%s458_s2 + $0x40] sm:$0xff] (%p32_p5)  ;;  %v86_v40 = vld [vmem:[%s458_s2 + $0x38] sm:$0xff] (%p32_p5) }
  0x27   :  { %131 = vmatprep.subr.mxu0 (%p32_p5), %v102_v24  ;;  %v85_v41 = vld [vmem:[%s458_s2 + $0x30] sm:$0xff] (%p32_p5)  ;;  %v84_v42 = vld [vmem:[%s458_s2 + $0x28] sm:$0xff] (%p32_p5)  ;;  %v83_v43 = vld [vmem:[%s458_s2 + $0x20] sm:$0xff] (%p32_p5) }
  0x28   : > { %77 = vst [vmem:[%s76_s29] sm:$0x1] %v75_v14  ;;  %132 = vmatpush1.msra.mxu0 (%p32_p5), %v101_v25  ;;  %v82_v44 = vld [vmem:[%s458_s2 + $0x18] sm:$0xff] (%p32_p5)  ;;  %v81_v45 = vld [vmem:[%s458_s2 + $0x10] sm:$0xff] (%p32_p5)  ;;  %v80_v46 = vld [vmem:[%s458_s2 + $0x8] sm:$0xff] (%p32_p5) }
  0x29   :  { %133 = vmatprep.subr.mxu0 %v100_v26  ;;  %v79_v47 = vld [vmem:[%s458_s2] sm:$0xff] }
  0x2a   :  { %134 = vmatpush1.msra.mxu0 %v99_v27  ;;  %v111_v52 = vld [vmem:[%s459_s3] sm:$0x3] }
  0x2b   :  { %135 = vmatprep.subr.mxu0 %v98_v28  ;;  %v116_v54 = vrot.slane %v111_v52, %v115_v51  ;;  %v120_v55 = vrot.slane %v111_v52, %v119_v53 }
  0x2c   :  { %136 = vmatpush1.msra.mxu0 %v97_v29 }
  0x2d   :  { %137 = vmatprep.subr.mxu0 %v96_v30 }
  0x2e   :  { %138 = vmatpush1.msra.mxu0 %v95_v31 }
  0x2f   :  { %139 = vmatprep.subr.mxu0 %v94_v32  ;;  %v78_v48 = vld [vmem:[#allocation2] sm:$0x3] }
  0x30   :  { %140 = vmatpush1.msra.mxu0 %v93_v33 }
  0x31   :  { %141 = vmatprep.subr.mxu0 %v92_v34 }
  0x32   :  { %142 = vmatpush1.msra.mxu0 %v91_v35 }
  0x33   :  { %143 = vmatprep.subr.mxu0 %v90_v36 }
  0x34   :  { %144 = vmatpush1.msra.mxu0 %v89_v37 }
  0x35   :  { %145 = vmatprep.subr.mxu0 %v88_v38 }
  0x36   :  { %146 = vmatpush1.msra.mxu0 %v87_v39 }
  0x37   :  { %147 = vmatprep.subr.mxu0 %v86_v40 }
  0x38   :  { %148 = vmatpush1.msra.mxu0 %v85_v41 }
  0x39   :  { %149 = vmatprep.subr.mxu0 %v84_v42 }
  0x3a   :  { %150 = vmatpush1.msra.mxu0 %v83_v43 }
  0x3b   :  { %151 = vmatprep.subr.mxu0 %v82_v44 }
  0x3c   :  { %152 = vmatpush1.msra.mxu0 %v81_v45 }
  0x3d   :  { %153 = vmatprep.subr.mxu0 %v80_v46 }
  0x3e   :  { %154 = vmatpush1.msra.mxu0 %v79_v47 }
  0x3f   :  { %188 = vmatmul.mubr.f32.vlgmr.msra.gmra.mxu0 %v78_v48 }
  0xff   :  { %v189_v56 = vpop.f32.mrf.mxu0 }
 0x100   :  { %v190_v57 = vadd.f32 %v189_v56, %v116_v54 }
 0x101   :  { %v191_v58 = vpop.f32.mrf.mxu0 }
 0x102   :  { %v192_v59 = vadd.f32 %v191_v58, %v120_v55  ;;  %v195_v60 = vsel %vm194_vm0, %v190_v57, -inf }
 0x104   :  { %v196_v61 = vsel %vm194_vm0, %v192_v59, -inf }
 0x105   :  { %v197_v62 = vmax.f32 %v195_v60, %v196_v61 }
 0x107   :  { %198 = vmax.xlane.f32.xlu0 %v197_v62 }
 0x190   :  { %v199_v63 = vpop.xlane.xlu0 %198 }
 0x191   :  { %v200_v0 = vsub.f32 %v190_v57, %v199_v63  ;;  %v201_v1 = vsub.f32 %v192_v59, %v199_v63 }
 0x193   :  { %v202_v2 = vmul.f32 1.442695, %v200_v0  ;;  %v204_v3 = vmul.f32 1.442695, %v201_v1 }
 0x195   :  { %258 = vpow2.f32 %v202_v2 }
 0x196   :  { %260 = vpow2.f32 %v204_v3 }
 0x1a2   :  { %v259_v4 = vpop.eup %258 }
 0x1a3   :  { %v261_v5 = vpop.eup %260  ;;  %v206_v6 = vsel %vm194_vm0, %v259_v4, 0.0 }
 0x1a4   :  { %v207_v7 = vsel %vm194_vm0, %v261_v5, 0.0 }
 0x1a5   :  { %v208_v8 = vadd.f32 %v207_v7, %v206_v6 }
 0x1a7   :  { %209 = vadd.xlane.f32.xlu0 %v208_v8 }
 0x230   :  { %v210_v9 = vpop.xlane.xlu0 %209 }
 0x231   :  { %262 = vlog2.f32 %v210_v9 }
 0x23e   :  { %v263_v10 = vpop.eup %262 }
 0x23f   :  { %v212_v11 = vmul.f32 0.6931472, %v263_v10 }
 0x241   :  { %v213_v12 = vsub.f32 %v200_v0, %v212_v11  ;;  %v214_v13 = vsub.f32 %v201_v1, %v212_v11 }
 0x243   :  { %v217_v14 = vcombine.low %v213_v12, %v214_v13 }
 0x245   :  { %247 = vst.sshfl [vmem:[%s460_s4] sm:$0x33 pattern:$0x76325410] %v217_v14 }
 0x246   :  { %231 = vsyncpa [#allocation4], 1 }

</bundles_post_ra>
